<compile_context>
chip_gen: v7x
topology: tpu7x:2x2x1
jax: 0.10.0
libtpu: 0.0.40
codegen_flags: <defaults>
</compile_context>

<pallas_src>
import functools

import jax
import jax.numpy as jnp
from jax import lax
from jax.experimental import pallas as pl
from jax.experimental.pallas import tpu as pltpu


def _chain_bmm_kernel(x1_ref, x2_ref, o_ref, *, bt, unroll):
    # Block shapes are (bt, N, N); loop over the bt sub-matrices so every
    # matmul is a full 2-D MXU contraction.
    def body(i, carry):
        x1 = x1_ref[i]  # (N, N)
        x2 = x2_ref[i]  # (N, N)
        # v5 = x2 @ x1^T : contract the last axis of both operands so the
        # transpose is folded into the MXU contraction (no XLU transpose).
        v5 = lax.dot_general(
            x2, x1,
            dimension_numbers=(((1,), (1,)), ((), ())),
            preferred_element_type=jnp.float32,
        )
        # v6 = x1 @ x2
        v6 = jnp.dot(x1, x2, preferred_element_type=jnp.float32)
        # out = v5 @ v6 : feed the MXU in the input dtype (bf16 path keeps the
        # operand bytes / MXU passes low), accumulate in f32.
        mx_dtype = x1_ref.dtype
        out = jnp.dot(v5.astype(mx_dtype), v6.astype(mx_dtype),
                      preferred_element_type=jnp.float32)
        o_ref[i] = out.astype(o_ref.dtype)
        return carry

    lax.fori_loop(0, bt, body, 0, unroll=unroll)


def _physical_vmem_bytes():
    try:
        info = pltpu.get_tpu_info()
        cap = getattr(info, "vmem_capacity_bytes", None)
        if cap:
            return int(cap)
    except Exception:
        pass
    return 64 * 1024 * 1024  # v7x (smallest per-TC VMEM) -> safe default


def chain_bmm(x1, x2, *, bt=None, compute_dtype=None, unroll=2):
    """out[b] = x2[b] @ x1[b].T @ x1[b] @ x2[b], matching the torch Model."""
    B, N, _ = x1.shape
    assert x1.shape == x2.shape == (B, N, N)
    out_dtype = x1.dtype
    if compute_dtype is not None:
        x1 = x1.astype(compute_dtype)
        x2 = x2.astype(compute_dtype)
    in_itemsize = jnp.dtype(x1.dtype).itemsize
    out_itemsize = jnp.dtype(out_dtype).itemsize

    # Scoped-VMEM ceiling: physical VMEM minus headroom (v7x = 64 MiB total).
    phys_vmem = _physical_vmem_bytes()
    vmem_cap = max(32 * 1024 * 1024, phys_vmem - 16 * 1024 * 1024)

    unroll = int(max(1, unroll))
    # Per batch element: double-buffered x1/x2 input blocks + output block.
    per_elem_block = (2 * 2 * N * N * in_itemsize) + (2 * N * N * out_itemsize)
    # Per live loop iteration: v5/v6/out f32 temps, times the unroll factor.
    temp_bytes = unroll * 3 * N * N * 4

    if bt is None:
        budget = int(0.75 * vmem_cap)
        bt_vmem = max(1, (budget - temp_bytes) // max(per_elem_block, 1))
        # >= ~4 grid steps: DMA/compute overlap + megacore sharding on v7x,
        # while still amortizing the ~0.35us per-grid-step overhead.
        bt_steps = max(1, B // 4)
        bt = int(max(1, min(bt_vmem, bt_steps, 8)))
    bt = int(max(1, min(bt, B)))

    grid = (pl.cdiv(B, bt),)  # ragged last block handled by Pallas (no padding)
    spec = pl.BlockSpec((bt, N, N), lambda b: (b, 0, 0))

    # 3 matmuls of N^3 MACs per batch element.
    flops = 3 * 2 * B * (N ** 3)
    bytes_accessed = B * N * N * (2 * in_itemsize + out_itemsize)

    block_bytes = bt * per_elem_block
    vmem_limit = int(min(vmem_cap,
                         max(32 * 1024 * 1024,
                             block_bytes + temp_bytes + (4 << 20))))

    kernel = functools.partial(_chain_bmm_kernel, bt=bt,
                               unroll=min(unroll, bt))

    return pl.pallas_call(
        kernel,
        out_shape=jax.ShapeDtypeStruct((B, N, N), out_dtype),
        grid_spec=pltpu.PrefetchScalarGridSpec(
            num_scalar_prefetch=0,
            grid=grid,
            in_specs=[spec, spec],
            out_specs=spec,
        ),
        compiler_params=pltpu.CompilerParams(
            dimension_semantics=("parallel",),
            vmem_limit_bytes=vmem_limit,
        ),
        cost_estimate=pl.CostEstimate(
            flops=flops, transcendentals=0, bytes_accessed=bytes_accessed
        ),
    )(x1, x2)


def _rel_err(a, b):
    return float(jnp.linalg.norm(a.astype(jnp.float32) - b) /
                 jnp.linalg.norm(b))


if __name__ == "__main__":
    key = jax.random.PRNGKey(0)
    k1, k2 = jax.random.split(key)
    B, N = 8, 128  # MXU/vreg-friendly square matrices; bt=2 -> 4 grid steps
    x1 = jax.random.normal(k1, (B, N, N), dtype=jnp.float32)
    x2 = jax.random.normal(k2, (B, N, N), dtype=jnp.float32)

    # Pure-JAX reference mirroring the torch forward exactly.
    v1 = jnp.transpose(x1, (0, 2, 1))
    v3 = jnp.transpose(v1, (0, 2, 1))
    v5 = jnp.einsum("bij,bjk->bik", x2, v1)
    v6 = jnp.einsum("bij,bjk->bik", v3, x2)
    ref = jnp.einsum("bij,bjk->bik", v5, v6)

    # f32 path (default, accuracy path).
    out = jax.block_until_ready(chain_bmm(x1, x2))
    assert out.shape == (B, N, N)
    assert _rel_err(out, ref) < 1e-2

    # Ragged batch (B not divisible by bt) exercises the partial last block
    # without any HBM zero-padding round trip.
    out_odd = jax.block_until_ready(chain_bmm(x1[:3], x2[:3], bt=2))
    assert _rel_err(out_odd, ref[:3]) < 1e-2

    # bf16-in / f32-accumulate MXU path (perf path on v6e/v7x).
    out_bf16 = jax.block_until_ready(
        chain_bmm(x1, x2, compute_dtype=jnp.bfloat16))
    assert _rel_err(out_bf16, ref) < 5e-2

    print("KERNEL_OK")
</pallas_src>

<mosaic_0001>
module attributes {stable_mosaic.version = 11 : i64} {
  func.func @_chain_bmm_kernel(%arg0: i32, %arg1: memref<2x128x128xf32, #tpu.memory_space<vmem>>, %arg2: memref<2x128x128xf32, #tpu.memory_space<vmem>>, %arg3: memref<2x128x128xf32, #tpu.memory_space<vmem>>) attributes {dimension_semantics = [#tpu.dimension_semantics<parallel>], iteration_bounds = array<i64: 4>, scalar_prefetch = 0 : i64, scratch_operands = 0 : i64, tpu.core_type = #tpu.core_type<tc>, window_params = [{transform_indices = @transform_0, window_bounds = array<i64: 2, 128, 128>}, {transform_indices = @transform_1, window_bounds = array<i64: 2, 128, 128>}, {transform_indices = @transform_2, window_bounds = array<i64: 2, 128, 128>}]} {
    %c0_i32 = arith.constant 0 : i32
    %0 = arith.index_cast %c0_i32 : i32 to index
    %c0 = arith.constant 0 : index
    %c0_0 = arith.constant 0 : index
    %1 = vector.load %arg1[%0, %c0, %c0_0] : memref<2x128x128xf32, #tpu.memory_space<vmem>>, vector<1x128x128xf32>
    %2 = vector.shape_cast %1 : vector<1x128x128xf32> to vector<128x128xf32>
    %3 = arith.index_cast %c0_i32 : i32 to index
    %c0_1 = arith.constant 0 : index
    %c0_2 = arith.constant 0 : index
    %4 = vector.load %arg2[%3, %c0_1, %c0_2] : memref<2x128x128xf32, #tpu.memory_space<vmem>>, vector<1x128x128xf32>
    %5 = vector.shape_cast %4 : vector<1x128x128xf32> to vector<128x128xf32>
    %cst = arith.constant dense<0.000000e+00> : vector<128x128xf32>
    %6 = tpu.matmul %5, %2, %cst {dimension_numbers = #tpu.dot_dimension_numbers<[1], [1], [0], [0], [0, 0, 1, 0], [], []>} : vector<128x128xf32>, vector<128x128xf32>, vector<128x128xf32> -> vector<128x128xf32>
    %cst_3 = arith.constant dense<0.000000e+00> : vector<128x128xf32>
    %7 = tpu.matmul %2, %5, %cst_3 {dimension_numbers = #tpu.dot_dimension_numbers<[1], [0], [0], [1], [0, 0, 1, 1], [], []>} : vector<128x128xf32>, vector<128x128xf32>, vector<128x128xf32> -> vector<128x128xf32>
    %cst_4 = arith.constant dense<0.000000e+00> : vector<128x128xf32>
    %8 = tpu.matmul %6, %7, %cst_4 {dimension_numbers = #tpu.dot_dimension_numbers<[1], [0], [0], [1], [0, 0, 1, 1], [], []>} : vector<128x128xf32>, vector<128x128xf32>, vector<128x128xf32> -> vector<128x128xf32>
    %9 = arith.index_cast %c0_i32 : i32 to index
    %c0_5 = arith.constant 0 : index
    %c0_6 = arith.constant 0 : index
    %10 = vector.load %arg3[%9, %c0_5, %c0_6] : memref<2x128x128xf32, #tpu.memory_space<vmem>>, vector<1x128x128xf32>
    %11 = vector.shape_cast %10 : vector<1x128x128xf32> to vector<128x128xf32>
    %12 = vector.shape_cast %8 : vector<128x128xf32> to vector<1x128x128xf32>
    tpu.vector_store %arg3[%9, %c0_5, %c0_6], %12 {strides = array<i32>} : memref<2x128x128xf32, #tpu.memory_space<vmem>>, vector<1x128x128xf32>,
    %c1_i32 = arith.constant 1 : i32
    %13 = arith.index_cast %c1_i32 : i32 to index
    %c0_7 = arith.constant 0 : index
    %c0_8 = arith.constant 0 : index
    %14 = vector.load %arg1[%13, %c0_7, %c0_8] : memref<2x128x128xf32, #tpu.memory_space<vmem>>, vector<1x128x128xf32>
    %15 = vector.shape_cast %14 : vector<1x128x128xf32> to vector<128x128xf32>
    %16 = arith.index_cast %c1_i32 : i32 to index
    %c0_9 = arith.constant 0 : index
    %c0_10 = arith.constant 0 : index
    %17 = vector.load %arg2[%16, %c0_9, %c0_10] : memref<2x128x128xf32, #tpu.memory_space<vmem>>, vector<1x128x128xf32>
    %18 = vector.shape_cast %17 : vector<1x128x128xf32> to vector<128x128xf32>
    %cst_11 = arith.constant dense<0.000000e+00> : vector<128x128xf32>
    %19 = tpu.matmul %18, %15, %cst_11 {dimension_numbers = #tpu.dot_dimension_numbers<[1], [1], [0], [0], [0, 0, 1, 0], [], []>} : vector<128x128xf32>, vector<128x128xf32>, vector<128x128xf32> -> vector<128x128xf32>
    %cst_12 = arith.constant dense<0.000000e+00> : vector<128x128xf32>
    %20 = tpu.matmul %15, %18, %cst_12 {dimension_numbers = #tpu.dot_dimension_numbers<[1], [0], [0], [1], [0, 0, 1, 1], [], []>} : vector<128x128xf32>, vector<128x128xf32>, vector<128x128xf32> -> vector<128x128xf32>
    %cst_13 = arith.constant dense<0.000000e+00> : vector<128x128xf32>
    %21 = tpu.matmul %19, %20, %cst_13 {dimension_numbers = #tpu.dot_dimension_numbers<[1], [0], [0], [1], [0, 0, 1, 1], [], []>} : vector<128x128xf32>, vector<128x128xf32>, vector<128x128xf32> -> vector<128x128xf32>
    %22 = arith.index_cast %c1_i32 : i32 to index
    %c0_14 = arith.constant 0 : index
    %c0_15 = arith.constant 0 : index
    %23 = vector.load %arg3[%22, %c0_14, %c0_15] : memref<2x128x128xf32, #tpu.memory_space<vmem>>, vector<1x128x128xf32>
    %24 = vector.shape_cast %23 : vector<1x128x128xf32> to vector<128x128xf32>
    %25 = vector.shape_cast %21 : vector<128x128xf32> to vector<1x128x128xf32>
    tpu.vector_store %arg3[%22, %c0_14, %c0_15], %25 {strides = array<i32>} : memref<2x128x128xf32, #tpu.memory_space<vmem>>, vector<1x128x128xf32>,
    %c2_i32 = arith.constant 2 : i32
    return
  }
  func.func @transform_0(%arg0: i32) -> (i32, i32, i32) {
    %c0_i32 = arith.constant 0 : i32
    %c0_i32_0 = arith.constant 0 : i32
    %c0_i32_1 = arith.constant 0 : i32
    return %arg0, %c0_i32, %c0_i32_0 : i32, i32, i32
  }
  func.func @transform_1(%arg0: i32) -> (i32, i32, i32) {
    %c0_i32 = arith.constant 0 : i32
    %c0_i32_0 = arith.constant 0 : i32
    %c0_i32_1 = arith.constant 0 : i32
    return %arg0, %c0_i32, %c0_i32_0 : i32, i32, i32
  }
  func.func @transform_2(%arg0: i32) -> (i32, i32, i32) {
    %c0_i32 = arith.constant 0 : i32
    %c0_i32_0 = arith.constant 0 : i32
    %c0_i32_1 = arith.constant 0 : i32
    return %arg0, %c0_i32, %c0_i32_0 : i32, i32, i32
  }
}

</mosaic_0001>

<bundles_post_ra>
// kernel: tpu_custom_call.1
= control target key start
LH: loop header
LB: loop body
LE: loop exit
PB: predicated region body
PF: predicated region fallthrough
CT: control target
= control target key end

     0   :  { %7 = vsyncpa [#allocation3], 0  ;;  %s2841_s0 = inlined_call_operand.hbm [shape: f32[8,128,128], index: 0, kind: input, shape index: {}]   ;;  %s2842_s1 = inlined_call_operand.hbm [shape: f32[8,128,128], index: 1, kind: input, shape index: {}]   ;;  %s2843_s2 = inlined_call_operand.hbm [shape: f32[8,128,128], index: 2, kind: output, shape index: {}]  }
   0x1   :  { %9 = vsyncpa [#allocation3 + $0x1], 0 }
   0x2   :  { %10 = vsyncpa [#allocation6], 0 }
   0x3   :  { %12 = vsyncpa [#allocation6 + $0x1], 0 }
   0x4   :  { %13 = vsyncpa [#allocation4], 0 }
   0x5   :  { %15 = vsyncpa [#allocation4 + $0x1], 0  ;;  %s2291_s9 = smov 0   ;;  %s2293_s10 = smov 0  }
   0x6   :  { %s2295_s11 = smov 0   ;;  %s2297_s12 = smov 0  }
   0x7 LB: > { %s2312_s13 = sadd.s32 4294967295, %s2267_s12   ;;  %s1287_s14 = sadd.s32 4294967294, %s2267_s12   ;;  %s2267_s12 = sphi %s2297_s12, %s2858_s12   ;;  %s2263_s11 = sphi %s2295_s11, %s2857_s11   ;;  %s2259_s10 = sphi %s2293_s10, %s2856_s10   ;;  %s2255_s9 = sphi %s2291_s9, %s2855_s9  }
   0x8   : > { %s2316_s15 = sadd.s32 1, %s2267_s12   ;;  %s28_s16 = sadd.s32 1, %s2263_s11 }
   0x9   : > { %s25_s17 = ssub.s32 %s2267_s12, %s2316_s15  ;;  %p35_p0 = scmp.ne.s32.totalorder %s2263_s11, %s2259_s10 }
   0xa   : > { %p26_p1 = scmp.eq.s32.totalorder %s25_s17, 0  ;;  %p36_p2 = scmp.eq.s32.totalorder %s2267_s12, 0 }
   0xb   : > { %p41_p3 = scmp.ne.s32.totalorder %s2259_s10, %s2255_s9  ;;  %p42_p4 = scmp.eq.s32.totalorder %s2312_s13, 0 }
   0xc   : > { %s2328_s18 = scalar_select %p26_p1, %s2263_s11, %s28_s16  }
   0xd   : > { %p2330_p5 = por %p36_p2, %p35_p0  ;;  %p2334_p6 = por %p42_p4, %p41_p3 }
   0xe   : > { %p91_p7 = scmp.eq.s32.totalorder %s2312_s13, 3  ;;  %p97_p8 = scmp.eq.s32.totalorder %s1287_s14, 3 }
   0xf   : > { %s2847_s20 = scalar_select %p2334_p6, 1, 0 }
  0x10   : > { %p2099_p9 = scmp.lt.s32.totalorder %s2267_s12, 4  ;;  %p2340_p10 = por %p91_p7, %p35_p0 }
  0x11   : > { %p2344_p11 = por %p97_p8, %p41_p3  ;;  %s2349_s23 = sand.u32 1, %s2263_s11  }
  0x12   : > { %s2848_s21 = scalar_select %p2340_p10, 1, 0 }
  0x13   : > { %s2849_s22 = scalar_select %p2344_p11, 1, 0 }
  0x14   : > { %s1357_s24 = sshll.u32 %s2267_s12, 12  ;;  %s1290_s25 = sshll.u32 %s2349_s23, 8 }
  0x15   : > { %s2358_s28 = scalar_lea.hbm %s2841_s0, %s1357_s24  ;;  %s121_s29 = scalar_lea.vmem [#allocation2], %s1290_s25 }
  0x16   : > { %s129_s30 = sshll.u32 %s121_s29, 4  ;;  %p2364_p12 = pnand %p2099_p9, %p2330_p5  ;;  %s2368_s30 = int_to_ptr.vmem [resolvable:$true] %s129_s30 }
  0x17   : > { %s118_s4 = scalar_lea.sflag [#allocation3], %s2349_s23  ;;  %s2137_s5 = scalar_lea.hbm %s2358_s28, 4096 }
  0x18   : > { %p2138_p13 = scmp.ne.s32.totalorder %s2358_s28, %s2137_s5  ;;  %p2139_p0 = pneg %p2364_p12 }
  0x19   : > { %s2142_s8 = scalar_lea.hbm %s2841_s0, 16384  ;;  %p2143_p3 = scmp.lt.u32.totalorder %s2358_s28, %s2841_s0 }
  0x1a   : > { %p2140_p1 = pnand %p2139_p0, %p2138_p13  ;;  %p2144_p4 = scmp.lt.u32.totalorder %s2142_s8, %s2137_s5 }
  0x1b   : > { %p2146_p7 = scmp.lt.u32.totalorder %s2137_s5, %s2358_s28 }
  0x1c   : > { %p2141_p2 = pneg %p2140_p1  ;;  %p2145_p5 = por %p2144_p4, %p2143_p3 }
  0x1e   : > { %p2147_p8 = por %p2146_p7, %p2145_p5 }
  0x20   : > { %p2148_p9 = pnand %p2147_p8, %p2141_p2 }
  0x22   : > { %2151 = shalt.err (!%p2148_p9)
}
  0x23   : > { %s2152_s17 = scalar_lea.vmem %s2368_s30, 4096  ;;  %s2269_s19 = smov [#allocation2]  }
  0x24   : > { %p2153_p13 = scmp.ne.s32.totalorder %s2368_s30, %s2152_s17  ;;  %s2157_s26 = sshll.u32 %s2269_s19, 4  ;;  %s2158_s26 = int_to_ptr.vmem [resolvable:$false] %s2157_s26 }
  0x25   : > { %s2159_s27 = scalar_lea.vmem %s2158_s26, 8192  ;;  %p2160_p10 = scmp.lt.s32.totalorder %s2368_s30, %s2158_s26 }
  0x26   : > { %p2155_p1 = pnand %p2153_p13, %p2139_p0  ;;  %p2161_p3 = scmp.lt.s32.totalorder %s2159_s27, %s2152_s17 }
  0x28   : > { %p2156_p11 = pneg %p2155_p1  ;;  %p2162_p4 = por %p2161_p3, %p2160_p10 }
  0x2a   : > { %p2163_p5 = pnand %p2162_p4, %p2156_p11 }
  0x2c   : > { %2166 = shalt.err (!%p2163_p5)
}
  0x2d   : > { %s2270_s29 = smov 128   ;;  %s2271_s5 = smov 8  }
  0x2e   : > { %2091 = dma.hbm_to_vmem [thread:$0]  (!%p2364_p12), %s2358_s28, 4096, %s2368_s30, %s118_s4, %s2270_s29, %s2270_s29, %s2271_s5  }
  0x2f   : > { %p1298_p10 = scmp.ge.s32.totalorder %s2267_s12, 1  ;;  %p159_p11 = scmp.lt.s32.totalorder %s2267_s12, 5 }
  0x30   : > { %s2412_s14 = scalar_lea.hbm %s2842_s1, %s1357_s24  ;;  %s143_s16 = scalar_lea.vmem [#allocation5], %s1290_s25 }
  0x31   : > { %p2403_p2 = pnand %p1298_p10, %p159_p11  ;;  %s151_s17 = sshll.u32 %s143_s16, 4  ;;  %s2416_s17 = int_to_ptr.vmem [resolvable:$true] %s151_s17 }
  0x32   : > { %s140_s28 = scalar_lea.sflag [#allocation6], %s2349_s23  ;;  %s2167_s30 = scalar_lea.hbm %s2412_s14, 4096 }
  0x33   : > { %p2168_p7 = scmp.ne.s32.totalorder %s2412_s14, %s2167_s30  ;;  %s2172_s24 = scalar_lea.hbm %s2842_s1, 16384 }
  0x34   : > { %p2173_p13 = scmp.lt.u32.totalorder %s2412_s14, %s2842_s1  ;;  %p2174_p1 = scmp.lt.u32.totalorder %s2172_s24, %s2167_s30 }
  0x35   : > { %p2170_p8 = pnand %p2168_p7, %p2139_p0  ;;  %p2176_p4 = scmp.lt.u32.totalorder %s2167_s30, %s2412_s14 }
  0x36   : > { %p2175_p3 = por %p2174_p1, %p2173_p13 }
  0x37   : > { %p2171_p9 = pneg %p2170_p8 }
  0x38   : > { %p2177_p5 = por %p2176_p4, %p2175_p3 }
  0x3a   : > { %p2178_p10 = pnand %p2177_p5, %p2171_p9 }
  0x3c   : > { %2181 = shalt.err (!%p2178_p10)
}
  0x3d   : > { %s2182_s25 = scalar_lea.vmem %s2416_s17, 4096  ;;  %s2272_s7 = smov [#allocation5]  }
  0x3e   : > { %p2183_p11 = scmp.ne.s32.totalorder %s2416_s17, %s2182_s25  ;;  %s2187_s8 = sshll.u32 %s2272_s7, 4  ;;  %s2188_s8 = int_to_ptr.vmem [resolvable:$false] %s2187_s8 }
  0x3f   : > { %s2189_s16 = scalar_lea.vmem %s2188_s8, 8192  ;;  %p2190_p6 = scmp.lt.s32.totalorder %s2416_s17, %s2188_s8 }
  0x40   : > { %p2185_p7 = pnand %p2183_p11, %p2139_p0  ;;  %p2191_p13 = scmp.lt.s32.totalorder %s2189_s16, %s2182_s25 }
  0x42   : > { %p2186_p8 = pneg %p2185_p7  ;;  %p2192_p1 = por %p2191_p13, %p2190_p6 }
  0x44   : > { %p2193_p3 = pnand %p2192_p1, %p2186_p8 }
  0x46   : > { %2196 = shalt.err (!%p2193_p3)
}
  0x47   : > { %2094 = dma.hbm_to_vmem [thread:$0]  (!%p2364_p12), %s2412_s14, 4096, %s2416_s17, %s140_s28, %s2270_s29, %s2270_s29, %s2271_s5  }
  0x48   : > { %163 = sbr.rel (%p2403_p2) target bundleno = 900 (0x384), region = 28  ;;  %s2450_s30 = sand.u32 (!%p2403_p2), 1, %s2259_s10  }
  0x49   : > { %s2453_s4 = sshll.u32 (!%p2403_p2), %s2450_s30, 8  ;;  %s166_s3 = scalar_lea.sflag (!%p2403_p2), [#allocation3], %s2450_s30 }
  0x4a   : > { %s2457_s19 = scalar_lea.vmem (!%p2403_p2), [#allocation2], %s2453_s4  ;;  %p2852_p6 = scmp.ne.s32.totalorder (!%p2403_p2), %s2847_s20, 0 }
  0x4f   : > { %2242 = dma.done.wait (%p2852_p6), %s166_s3, 4096  }
  0x50   : > { %2244 = vsyncadd (%p2852_p6), %s166_s3, 4294963200  ;;  %s175_s23 = scalar_lea.sflag [#allocation6], %s2450_s30  ;;  %s2465_s29 = scalar_lea.vmem [#allocation5], %s2453_s4 }
  0x51   : > { %2246 = dma.done.wait (%p2852_p6), %s175_s23, 4096  }
  0x52   : > { %2248 = vsyncadd (%p2852_p6), %s175_s23, 4294963200  ;;  %v207_v0 = vld [vmem:[%s2457_s19] sm:$0xff]  ;;  %v2473_v1 = vld [vmem:[%s2457_s19 + $0x8] sm:$0xff]  ;;  %s2742_s20 = scalar_lea.vmem [#allocation7], %s2453_s4  ;;  %s1361_s5 = sshll.u32 %s2312_s13, 12 }
  0x53   : > { %v223_v2 = vld [vmem:[%s2465_s29] sm:$0xff]  ;;  %v1890_v3 = vpack.c.bf16 %v2473_v1, %v207_v0  ;;  %v2478_v4 = vld [vmem:[%s2465_s29 + $0x8] sm:$0xff]  ;;  %v2481_v5 = vld [vmem:[%s2465_s29 + $0x10] sm:$0xff]  ;;  %1642 = vmatprep.mubr.f32.mxu1 %v207_v0  ;;  %s1191_s6 = sshll.u32 %s2742_s20, 4  ;;  %s2794_s28 = scalar_lea.hbm %s2843_s2, %s1361_s5  ;;  %s2796_s6 = int_to_ptr.vmem [resolvable:$true] %s1191_s6 }
  0x54   : > { %v2484_v6 = vld [vmem:[%s2465_s29 + $0x18] sm:$0xff]  ;;  %1586 = vmatprep.mubr.f32.mxu0 %v223_v2  ;;  %v1922_v7 = vpack.c.bf16 %v2478_v4, %v223_v2  ;;  %v209_v9 = vld [vmem:[%s2457_s19 + $0x10] sm:$0xff]  ;;  %v2492_v12 = vld [vmem:[%s2465_s29 + $0x20] sm:$0xff]  ;;  %s1177_s24 = scalar_lea.sflag [#allocation4], %s2450_s30  ;;  %s2197_s13 = scalar_lea.vmem %s2796_s6, 4096 }
  0x55   : > { %v1926_v8 = vpack.c.bf16 %v2484_v6, %v2481_v5  ;;  %v210_v10 = vld [vmem:[%s2457_s19 + $0x18] sm:$0xff]  ;;  %1891 = vmatprep.subr.bf16.mxu0 %v1890_v3  ;;  %v2495_v13 = vld [vmem:[%s2465_s29 + $0x28] sm:$0xff]  ;;  %v211_v15 = vld [vmem:[%s2457_s19 + $0x20] sm:$0xff]  ;;  %p2198_p12 = scmp.ne.s32.totalorder %s2796_s6, %s2197_s13  ;;  %p2853_p0 = scmp.ne.s32.totalorder %s2848_s21, 0 }
  0x56   : > { %v1894_v11 = vpack.c.bf16 %v210_v10, %v209_v9  ;;  %1923 = vmatprep.subr.bf16.mxu1 %v1922_v7  ;;  %1893 = vmatpush3.bf16.xpose.msra.mxu0 %v1890_v3  ;;  %v1930_v14 = vpack.c.bf16 %v2495_v13, %v2492_v12  ;;  %v212_v16 = vld [vmem:[%s2457_s19 + $0x28] sm:$0xff]  ;;  %v2502_v17 = vld [vmem:[%s2465_s29 + $0x30] sm:$0xff]  ;;  %v2505_v18 = vld [vmem:[%s2465_s29 + $0x38] sm:$0xff]  ;;  %s2273_s26 = smov [#allocation7]  }
  0x57   : > { %1925 = vmatpush3.bf16.msra.mxu1 %v1922_v7  ;;  %v1898_v19 = vpack.c.bf16 %v212_v16, %v211_v15  ;;  %v1934_v20 = vpack.c.bf16 %v2505_v18, %v2502_v17  ;;  %v2510_v21 = vld [vmem:[%s2465_s29 + $0x40] sm:$0xff]  ;;  %v2513_v22 = vld [vmem:[%s2465_s29 + $0x48] sm:$0xff]  ;;  %v213_v24 = vld [vmem:[%s2457_s19 + $0x30] sm:$0xff]  ;;  %p2199_p2 = pnand %p2198_p12, %p2853_p0  ;;  %s2201_s27 = sshll.u32 %s2273_s26, 4  ;;  %s2202_s27 = int_to_ptr.vmem [resolvable:$false] %s2201_s27 }
  0x58   : > { %1895 = vmatprep.subr.bf16.mxu0 %v1894_v11  ;;  %1927 = vmatprep.subr.bf16.mxu1 %v1926_v8  ;;  %v1938_v23 = vpack.c.bf16 %v2513_v22, %v2510_v21  ;;  %v214_v25 = vld [vmem:[%s2457_s19 + $0x38] sm:$0xff]  ;;  %v2520_v26 = vld [vmem:[%s2465_s29 + $0x50] sm:$0xff]  ;;  %v235_v30 = vld [vmem:[%s2465_s29 + $0x60] sm:$0xff]  ;;  %s2203_s25 = scalar_lea.vmem %s2202_s27, 8192  ;;  %p2204_p4 = scmp.lt.s32.totalorder %s2796_s6, %s2202_s27 }
  0x59   : > { %v2523_v27 = vld [vmem:[%s2465_s29 + $0x58] sm:$0xff]  ;;  %v1902_v28 = vpack.c.bf16 %v214_v25, %v213_v24  ;;  %v236_v31 = vld [vmem:[%s2465_s29 + $0x68] sm:$0xff]  ;;  %v215_v33 = vld [vmem:[%s2457_s19 + $0x40] sm:$0xff]  ;;  %p2200_p9 = pneg %p2199_p2  ;;  %p2205_p5 = scmp.lt.s32.totalorder %s2203_s25, %s2197_s13 }
  0x5a   : > { %v1942_v29 = vpack.c.bf16 %v2523_v27, %v2520_v26  ;;  %v1946_v32 = vpack.c.bf16 %v236_v31, %v235_v30  ;;  %v216_v34 = vld [vmem:[%s2457_s19 + $0x48] sm:$0xff]  ;;  %v237_v35 = vld [vmem:[%s2465_s29 + $0x70] sm:$0xff]  ;;  %v238_v36 = vld [vmem:[%s2465_s29 + $0x78] sm:$0xff] }
  0x5b   : > { %1929 = vmatpush3.bf16.msra.mxu1 %v1926_v8  ;;  %v1906_v37 = vpack.c.bf16 %v216_v34, %v215_v33  ;;  %v1950_v38 = vpack.c.bf16 %v238_v36, %v237_v35  ;;  %v217_v39 = vld [vmem:[%s2457_s19 + $0x50] sm:$0xff]  ;;  %v218_v40 = vld [vmem:[%s2457_s19 + $0x58] sm:$0xff]  ;;  %v219_v42 = vld [vmem:[%s2457_s19 + $0x60] sm:$0xff]  ;;  %p2206_p10 = por %p2205_p5, %p2204_p4 }
  0x5c   : > { %1931 = vmatprep.subr.bf16.mxu1 %v1930_v14  ;;  %v1910_v41 = vpack.c.bf16 %v218_v40, %v217_v39  ;;  %v220_v43 = vld [vmem:[%s2457_s19 + $0x68] sm:$0xff]  ;;  %v221_v45 = vld [vmem:[%s2457_s19 + $0x70] sm:$0xff]  ;;  %v222_v46 = vld [vmem:[%s2457_s19 + $0x78] sm:$0xff] }
  0x5d   : > { %v1914_v44 = vpack.c.bf16 %v220_v43, %v219_v42  ;;  %v1918_v47 = vpack.c.bf16 %v222_v46, %v221_v45  ;;  %v2552_v48 = vld [vmem:[%s2465_s29 + $0x80] sm:$0xff]  ;;  %v2558_v50 = vld [vmem:[%s2457_s19 + $0x88] sm:$0xff]  ;;  %v2564_v52 = vld [vmem:[%s2457_s19 + $0x90] sm:$0xff]  ;;  %p2207_p11 = pnand %p2206_p10, %p2200_p9 }
  0x5e   : > { %1897 = vmatpush3.bf16.xpose.msra.mxu0 %v1894_v11  ;;  %v2555_v49 = vld [vmem:[%s2457_s19 + $0x80] sm:$0xff]  ;;  %v2567_v53 = vld [vmem:[%s2457_s19 + $0x98] sm:$0xff]  ;;  %v2575_v56 = vld [vmem:[%s2457_s19 + $0xa8] sm:$0xff] }
  0x5f   : > { %1933 = vmatpush3.bf16.msra.mxu1 %v1930_v14  ;;  %1899 = vmatprep.subr.bf16.mxu0 %v1898_v19  ;;  %v1986_v51 = vpack.c.bf16 %v2558_v50, %v2555_v49  ;;  %v1990_v54 = vpack.c.bf16 %v2567_v53, %v2564_v52  ;;  %v2572_v55 = vld [vmem:[%s2457_s19 + $0xa0] sm:$0xff]  ;;  %v2580_v58 = vld [vmem:[%s2457_s19 + $0xb0] sm:$0xff]  ;;  %v2583_v59 = vld [vmem:[%s2457_s19 + $0xb8] sm:$0xff] }
  0x60   : > { %1935 = vmatprep.subr.bf16.mxu1 %v1934_v20  ;;  %v1994_v57 = vpack.c.bf16 %v2575_v56, %v2572_v55  ;;  %v1998_v60 = vpack.c.bf16 %v2583_v59, %v2580_v58  ;;  %v2588_v61 = vld [vmem:[%s2457_s19 + $0xc0] sm:$0xff]  ;;  %v2591_v62 = vld [vmem:[%s2457_s19 + $0xc8] sm:$0xff]  ;;  %v2596_v0 = vld [vmem:[%s2457_s19 + $0xd0] sm:$0xff] }
  0x61   : > { %v2002_v63 = vpack.c.bf16 %v2591_v62, %v2588_v61  ;;  %v2604_v3 = vld [vmem:[%s2457_s19 + $0xe0] sm:$0xff]  ;;  %v2615_v7 = vld [vmem:[%s2457_s19 + $0xf8] sm:$0xff]  ;;  %v2639_v14 = vld [vmem:[%s2465_s29 + $0xb0] sm:$0xff] }
  0x62   : > { %v2628_v11 = vld [vmem:[%s2465_s29 + $0x98] sm:$0xff] }
  0x63   : > { %1937 = vmatpush3.bf16.msra.mxu1 %v1934_v20  ;;  %v2663_v20 = vld [vmem:[%s2465_s29 + $0xe0] sm:$0xff] }
  0x64   : > { %1939 = vmatprep.subr.bf16.mxu1 %v1938_v23 }
  0x66   : > { %1901 = vmatpush3.bf16.xpose.msra.mxu0 %v1898_v19  ;;  %v2660_v19 = vld [vmem:[%s2465_s29 + $0xd8] sm:$0xff] }
  0x67   : > { %1941 = vmatpush3.bf16.msra.mxu1 %v1938_v23  ;;  %1903 = vmatprep.subr.bf16.mxu0 %v1902_v28 }
  0x68   : > { %1943 = vmatprep.subr.bf16.mxu1 %v1942_v29 }
  0x6b   : > { %1945 = vmatpush3.bf16.msra.mxu1 %v1942_v29 }
  0x6c   : > { %1947 = vmatprep.subr.bf16.mxu1 %v1946_v32 }
  0x6e   : > { %1905 = vmatpush3.bf16.xpose.msra.mxu0 %v1902_v28 }
  0x6f   : > { %1949 = vmatpush3.bf16.msra.mxu1 %v1946_v32  ;;  %1907 = vmatprep.subr.bf16.mxu0 %v1906_v37 }
  0x70   : > { %1951 = vmatprep.subr.bf16.mxu1 %v1950_v38 }
  0x73   : > { %1953 = vmatpush3.bf16.msra.mxu1 %v1950_v38 }
  0x76   : > { %1643 = vmatmul.mubr.f32.vlgmr.msra.gmra.mrb[0].mxu1 %v2473_v1  ;;  %1909 = vmatpush3.bf16.xpose.msra.mxu0 %v1906_v37  ;;  %v2599_v1 = vld [vmem:[%s2457_s19 + $0xd8] sm:$0xff] }
  0x77   : > { %1645 = vmatprep.mubr.f32.mxu1 %v209_v9  ;;  %1911 = vmatprep.subr.bf16.mxu0 %v1910_v41  ;;  %v2006_v2 = vpack.c.bf16 %v2599_v1, %v2596_v0  ;;  %v2620_v9 = vld [vmem:[%s2465_s29 + $0x88] sm:$0xff] }
  0x7a   : > { %1646 = vmatmul.mubr.f32.gmra.mrb[2].mxu1 %v210_v10  ;;  %v2623_v10 = vld [vmem:[%s2465_s29 + $0x90] sm:$0xff] }
  0x7b   : > { %1648 = vmatprep.mubr.f32.mxu1 %v211_v15  ;;  %v2644_v15 = vld [vmem:[%s2465_s29 + $0xb8] sm:$0xff] }
  0x7e   : > { %1649 = vmatmul.mubr.f32.gmra.mrb[4].mxu1 %v212_v16  ;;  %1913 = vmatpush3.bf16.xpose.msra.mxu0 %v1910_v41  ;;  %v2647_v16 = vld [vmem:[%s2465_s29 + $0xc0] sm:$0xff] }
  0x7f   : > { %1651 = vmatprep.mubr.f32.mxu1 %v213_v24  ;;  %1915 = vmatprep.subr.bf16.mxu0 %v1914_v44  ;;  %v2676_v24 = vld [vmem:[%s2465_s29 + $0xf8] sm:$0xff] }
  0x82   : > { %1652 = vmatmul.mubr.f32.gmra.mrb[6].mxu1 %v214_v25 }
  0x83   : > { %1654 = vmatprep.mubr.f32.mxu1 %v215_v33 }
  0x86   : > { %1655 = vmatmul.mubr.f32.gmra.mrb[8].mxu1 %v216_v34  ;;  %1917 = vmatpush3.bf16.xpose.msra.mxu0 %v1914_v44 }
  0x87   : > { %1657 = vmatprep.mubr.f32.mxu1 %v217_v39  ;;  %1919 = vmatprep.subr.bf16.mxu0 %v1918_v47 }
  0x8a   : > { %1658 = vmatmul.mubr.f32.gmra.mrb[10].mxu1 %v218_v40 }
  0x8b   : > { %1660 = vmatprep.mubr.f32.mxu1 %v219_v42 }
  0x8e   : > { %1661 = vmatmul.mubr.f32.gmra.mrb[12].mxu1 %v220_v43  ;;  %1921 = vmatpush3.bf16.xpose.msra.mxu0 %v1918_v47 }
  0x8f   : > { %1663 = vmatprep.mubr.f32.mxu1 %v221_v45  ;;  %1987 = vmatprep.subr.bf16.mxu0 %v1986_v51 }
  0x92   : > { %1664 = vmatmul.mubr.f32.gmra.mrb[14].mxu1 %v222_v46 }
  0x95   : > { %1587 = vmatmul.mubr.f32.vlgmr.msra.gmra.mrb[0].mxu0 %v2478_v4  ;;  %v2607_v4 = vld [vmem:[%s2457_s19 + $0xe8] sm:$0xff] }
  0x96   : > { %1589 = vmatprep.mubr.f32.mxu0 %v2481_v5  ;;  %1989 = vmatpush3.bf16.xpose.msra.mxu0 %v1986_v51  ;;  %v2010_v5 = vpack.c.bf16 %v2607_v4, %v2604_v3  ;;  %v2018_v51 = vpack.c.bf16 %v2620_v9, %v2552_v48 }
  0x97   : > { %1991 = vmatprep.subr.bf16.mxu0 %v1990_v54 }
  0x99   : > { %1590 = vmatmul.mubr.f32.gmra.mrb[2].mxu0 %v2484_v6  ;;  %v2612_v6 = vld [vmem:[%s2457_s19 + $0xf0] sm:$0xff] }
  0x9a   : > { %1592 = vmatprep.mubr.f32.mxu0 %v2492_v12  ;;  %v2014_v8 = vpack.c.bf16 %v2615_v7, %v2612_v6  ;;  %v2631_v12 = vld [vmem:[%s2465_s29 + $0xa0] sm:$0xff] }
  0x9d   : > { %1593 = vmatmul.mubr.f32.gmra.mrb[4].mxu0 %v2495_v13  ;;  %v2636_v13 = vld [vmem:[%s2465_s29 + $0xa8] sm:$0xff] }
  0x9e   : > { %1595 = vmatprep.mubr.f32.mxu0 %v2502_v17  ;;  %1993 = vmatpush3.bf16.xpose.msra.mxu0 %v1990_v54  ;;  %v2652_v17 = vld [vmem:[%s2465_s29 + $0xc8] sm:$0xff] }
  0x9f   : > { %1995 = vmatprep.subr.bf16.mxu0 %v1994_v57 }
  0xa1   : > { %1596 = vmatmul.mubr.f32.gmra.mrb[6].mxu0 %v2505_v18  ;;  %v2655_v18 = vld [vmem:[%s2465_s29 + $0xd0] sm:$0xff] }
  0xa2   : > { %1598 = vmatprep.mubr.f32.mxu0 %v2510_v21  ;;  %v2668_v21 = vld [vmem:[%s2465_s29 + $0xe8] sm:$0xff] }
  0xa5   : > { %1599 = vmatmul.mubr.f32.gmra.mrb[8].mxu0 %v2513_v22  ;;  %v2671_v22 = vld [vmem:[%s2465_s29 + $0xf0] sm:$0xff] }
  0xa6   : > { %1601 = vmatprep.mubr.f32.mxu0 %v2520_v26  ;;  %1997 = vmatpush3.bf16.xpose.msra.mxu0 %v1994_v57 }
  0xa7   : > { %1999 = vmatprep.subr.bf16.mxu0 %v1998_v60 }
  0xa9   : > { %1602 = vmatmul.mubr.f32.gmra.mrb[10].mxu0 %v2523_v27 }
  0xaa   : > { %1604 = vmatprep.mubr.f32.mxu0 %v235_v30 }
  0xad   : > { %1605 = vmatmul.mubr.f32.gmra.mrb[12].mxu0 %v236_v31 }
  0xae   : > { %1607 = vmatprep.mubr.f32.mxu0 %v237_v35  ;;  %2001 = vmatpush3.bf16.xpose.msra.mxu0 %v1998_v60  ;;  %v2022_v60 = vpack.c.bf16 %v2628_v11, %v2623_v10 }
  0xaf   : > { %2003 = vmatprep.subr.bf16.mxu0 %v2002_v63 }
  0xb1   : > { %1608 = vmatmul.mubr.f32.gmra.mrb[14].mxu0 %v238_v36 }
  0xb2   : > { %1754 = vmatprep.mubr.f32.mxu0 %v2552_v48 }
  0xb6   : > { %2005 = vmatpush3.bf16.xpose.msra.mxu0 %v2002_v63 }
  0xb7   : > { %2007 = vmatprep.subr.bf16.mxu0 %v2006_v2 }
  0xbe   : > { %2009 = vmatpush3.bf16.xpose.msra.mxu0 %v2006_v2 }
  0xbf   : > { %2011 = vmatprep.subr.bf16.mxu0 %v2010_v5 }
  0xc6   : > { %2013 = vmatpush3.bf16.xpose.msra.mxu0 %v2010_v5  ;;  %v2026_v5 = vpack.c.bf16 %v2636_v13, %v2631_v12 }
  0xc7   : > { %2015 = vmatprep.subr.bf16.mxu0 %v2014_v8 }
  0xce   : > { %2017 = vmatpush3.bf16.xpose.msra.mxu0 %v2014_v8 }
  0xd5   : > { %1755 = vmatmul.mubr.f32.vlgmr.msra.gmra.mrb[16].mxu0 %v2620_v9  ;;  %v2030_v9 = vpack.c.bf16 %v2644_v15, %v2639_v14 }
  0xd6   : > { %1757 = vmatprep.mubr.f32.mxu0 %v2623_v10 }
  0xd9   : > { %1758 = vmatmul.mubr.f32.gmra.mrb[18].mxu0 %v2628_v11  ;;  %v2034_v11 = vpack.c.bf16 %v2652_v17, %v2647_v16 }
  0xda   : > { %1760 = vmatprep.mubr.f32.mxu0 %v2631_v12 }
  0xdd   : > { %1761 = vmatmul.mubr.f32.gmra.mrb[20].mxu0 %v2636_v13  ;;  %v2038_v13 = vpack.c.bf16 %v2660_v19, %v2655_v18 }
  0xde   : > { %1763 = vmatprep.mubr.f32.mxu0 %v2639_v14 }
  0xe1   : > { %1764 = vmatmul.mubr.f32.gmra.mrb[22].mxu0 %v2644_v15  ;;  %v2042_v15 = vpack.c.bf16 %v2668_v21, %v2663_v20 }
  0xe2   : > { %1766 = vmatprep.mubr.f32.mxu0 %v2647_v16 }
  0xe5   : > { %1767 = vmatmul.mubr.f32.gmra.mrb[24].mxu0 %v2652_v17  ;;  %v2046_v17 = vpack.c.bf16 %v2676_v24, %v2671_v22 }
  0xe6   : > { %1769 = vmatprep.mubr.f32.mxu0 %v2655_v18 }
  0xe9   : > { %1770 = vmatmul.mubr.f32.gmra.mrb[26].mxu0 %v2660_v19 }
  0xea   : > { %1772 = vmatprep.mubr.f32.mxu0 %v2663_v20 }
  0xed   : > { %1773 = vmatmul.mubr.f32.gmra.mrb[28].mxu0 %v2668_v21 }
  0xee   : > { %1775 = vmatprep.mubr.f32.mxu0 %v2671_v22 }
  0xf1   : > { %1776 = vmatmul.mubr.f32.gmra.mrb[30].mxu0 %v2676_v24 }
 0x149   : > { %v1644_v23 = vpop.f32.mrb[0].mxu1 }
 0x14a   : > { %v450_v25 = vpop.f32.mrb[1].mxu1 }
 0x14b   : > { %v1954_v26 = vpack.c.bf16 %v1644_v23, %v450_v25 }
 0x14d   : > { %v1647_v27 = vpop.f32.mrb[2].mxu1  ;;  %1955 = vmatprep.subr.bf16.mxu1 %v1954_v26 }
 0x14e   : > { %v460_v28 = vpop.f32.mrb[3].mxu1  ;;  %1957 = vmatpush3.bf16.msra.mxu1 %v1954_v26 }
 0x14f   : > { %v1958_v29 = vpack.c.bf16 %v1647_v27, %v460_v28 }
 0x151   : > { %v1650_v30 = vpop.f32.mrb[4].mxu1  ;;  %1959 = vmatprep.subr.bf16.mxu1 %v1958_v29 }
 0x152   : > { %v470_v31 = vpop.f32.mrb[5].mxu1  ;;  %1961 = vmatpush3.bf16.msra.mxu1 %v1958_v29 }
 0x153   : > { %v1962_v32 = vpack.c.bf16 %v1650_v30, %v470_v31 }
 0x155   : > { %v1653_v33 = vpop.f32.mrb[6].mxu1  ;;  %1963 = vmatprep.subr.bf16.mxu1 %v1962_v32 }
 0x156   : > { %v480_v34 = vpop.f32.mrb[7].mxu1  ;;  %1965 = vmatpush3.bf16.msra.mxu1 %v1962_v32 }
 0x157   : > { %v1966_v35 = vpack.c.bf16 %v1653_v33, %v480_v34 }
 0x159   : > { %v1656_v36 = vpop.f32.mrb[8].mxu1  ;;  %1967 = vmatprep.subr.bf16.mxu1 %v1966_v35 }
 0x15a   : > { %v490_v37 = vpop.f32.mrb[9].mxu1  ;;  %1969 = vmatpush3.bf16.msra.mxu1 %v1966_v35 }
 0x15b   : > { %v1970_v38 = vpack.c.bf16 %v1656_v36, %v490_v37 }
 0x15d   : > { %v1659_v39 = vpop.f32.mrb[10].mxu1  ;;  %1971 = vmatprep.subr.bf16.mxu1 %v1970_v38 }
 0x15e   : > { %v500_v40 = vpop.f32.mrb[11].mxu1  ;;  %1973 = vmatpush3.bf16.msra.mxu1 %v1970_v38 }
 0x15f   : > { %v1974_v41 = vpack.c.bf16 %v1659_v39, %v500_v40 }
 0x161   : > { %v1662_v42 = vpop.f32.mrb[12].mxu1  ;;  %1975 = vmatprep.subr.bf16.mxu1 %v1974_v41 }
 0x162   : > { %v510_v43 = vpop.f32.mrb[13].mxu1  ;;  %1977 = vmatpush3.bf16.msra.mxu1 %v1974_v41 }
 0x163   : > { %v1978_v44 = vpack.c.bf16 %v1662_v42, %v510_v43 }
 0x165   : > { %v1665_v45 = vpop.f32.mrb[14].mxu1  ;;  %1979 = vmatprep.subr.bf16.mxu1 %v1978_v44 }
 0x166   : > { %v520_v46 = vpop.f32.mrb[15].mxu1  ;;  %1981 = vmatpush3.bf16.msra.mxu1 %v1978_v44 }
 0x167   : > { %v1982_v47 = vpack.c.bf16 %v1665_v45, %v520_v46 }
 0x168   : > { %v1588_v54 = vpop.f32.mrb[0].mxu0 }
 0x169   : > { %1983 = vmatprep.subr.bf16.mxu1 %v1982_v47  ;;  %v305_v57 = vpop.f32.mrb[1].mxu0 }
 0x16a   : > { %1985 = vmatpush3.bf16.msra.mxu1 %v1982_v47  ;;  %1698 = vmatprep.mubr.f32.mxu1 %v305_v57 }
 0x16b   : > { %2019 = vmatprep.subr.bf16.mxu1 %v2018_v51 }
 0x16c   : > { %v1591_v63 = vpop.f32.mrb[2].mxu0 }
 0x16d   : > { %1699 = vmatmul.mubr.f32.vlgmr.msra.gmra.mrb[16].mxu1 %v1588_v54  ;;  %v315_v2 = vpop.f32.mrb[3].mxu0 }
 0x16e   : > { %2021 = vmatpush3.bf16.msra.mxu1 %v2018_v51  ;;  %1701 = vmatprep.mubr.f32.mxu1 %v315_v2 }
 0x16f   : > { %2023 = vmatprep.subr.bf16.mxu1 %v2022_v60 }
 0x170   : > { %v1594_v8 = vpop.f32.mrb[4].mxu0 }
 0x171   : > { %1702 = vmatmul.mubr.f32.gmra.mrb[18].mxu1 %v1591_v63  ;;  %v325_v48 = vpop.f32.mrb[5].mxu0 }
 0x172   : > { %2025 = vmatpush3.bf16.msra.mxu1 %v2022_v60  ;;  %1704 = vmatprep.mubr.f32.mxu1 %v325_v48 }
 0x173   : > { %2027 = vmatprep.subr.bf16.mxu1 %v2026_v5 }
 0x174   : > { %v1597_v23 = vpop.f32.mrb[6].mxu0 }
 0x175   : > { %1705 = vmatmul.mubr.f32.gmra.mrb[20].mxu1 %v1594_v8  ;;  %v335_v10 = vpop.f32.mrb[7].mxu0 }
 0x176   : > { %2029 = vmatpush3.bf16.msra.mxu1 %v2026_v5  ;;  %1707 = vmatprep.mubr.f32.mxu1 %v335_v10 }
 0x177   : > { %2031 = vmatprep.subr.bf16.mxu1 %v2030_v9 }
 0x178   : > { %v1600_v25 = vpop.f32.mrb[8].mxu0 }
 0x179   : > { %1708 = vmatmul.mubr.f32.gmra.mrb[22].mxu1 %v1597_v23  ;;  %v345_v12 = vpop.f32.mrb[9].mxu0 }
 0x17a   : > { %2033 = vmatpush3.bf16.msra.mxu1 %v2030_v9  ;;  %1710 = vmatprep.mubr.f32.mxu1 %v345_v12 }
 0x17b   : > { %2035 = vmatprep.subr.bf16.mxu1 %v2034_v11 }
 0x17c   : > { %v1603_v26 = vpop.f32.mrb[10].mxu0 }
 0x17d   : > { %1711 = vmatmul.mubr.f32.gmra.mrb[24].mxu1 %v1600_v25  ;;  %v355_v14 = vpop.f32.mrb[11].mxu0 }
 0x17e   : > { %2037 = vmatpush3.bf16.msra.mxu1 %v2034_v11  ;;  %1713 = vmatprep.mubr.f32.mxu1 %v355_v14 }
 0x17f   : > { %2039 = vmatprep.subr.bf16.mxu1 %v2038_v13 }
 0x180   : > { %v1606_v27 = vpop.f32.mrb[12].mxu0 }
 0x181   : > { %1714 = vmatmul.mubr.f32.gmra.mrb[26].mxu1 %v1603_v26  ;;  %v365_v16 = vpop.f32.mrb[13].mxu0 }
 0x182   : > { %2041 = vmatpush3.bf16.msra.mxu1 %v2038_v13  ;;  %1716 = vmatprep.mubr.f32.mxu1 %v365_v16 }
 0x183   : > { %2043 = vmatprep.subr.bf16.mxu1 %v2042_v15 }
 0x184   : > { %v1609_v28 = vpop.f32.mrb[14].mxu0 }
 0x185   : > { %1717 = vmatmul.mubr.f32.gmra.mrb[28].mxu1 %v1606_v27  ;;  %v375_v18 = vpop.f32.mrb[15].mxu0 }
 0x186   : > { %2045 = vmatpush3.bf16.msra.mxu1 %v2042_v15  ;;  %1719 = vmatprep.mubr.f32.mxu1 %v375_v18 }
 0x187   : > { %2047 = vmatprep.subr.bf16.mxu1 %v2046_v17 }
 0x189   : > { %1720 = vmatmul.mubr.f32.gmra.mrb[30].mxu1 %v1609_v28 }
 0x18a   : > { %2049 = vmatpush3.bf16.msra.mxu1 %v2046_v17  ;;  %1810 = vmatprep.mubr.f32.mxu1 %v2555_v49 }
 0x18d   : > { %1811 = vmatmul.mubr.f32.vlgmr.msra.gmra.mrb[32].mxu1 %v2558_v50 }
 0x18e   : > { %1813 = vmatprep.mubr.f32.mxu1 %v2564_v52 }
 0x191   : > { %1814 = vmatmul.mubr.f32.gmra.mrb[34].mxu1 %v2567_v53 }
 0x192   : > { %1816 = vmatprep.mubr.f32.mxu1 %v2572_v55 }
 0x195   : > { %1817 = vmatmul.mubr.f32.gmra.mrb[36].mxu1 %v2575_v56 }
 0x196   : > { %1819 = vmatprep.mubr.f32.mxu1 %v2580_v58 }
 0x199   : > { %1820 = vmatmul.mubr.f32.gmra.mrb[38].mxu1 %v2583_v59 }
 0x19a   : > { %1822 = vmatprep.mubr.f32.mxu1 %v2588_v61 }
 0x19d   : > { %1823 = vmatmul.mubr.f32.gmra.mrb[40].mxu1 %v2591_v62 }
 0x19e   : > { %1825 = vmatprep.mubr.f32.mxu1 %v2596_v0 }
 0x1a1   : > { %1826 = vmatmul.mubr.f32.gmra.mrb[42].mxu1 %v2599_v1 }
 0x1a2   : > { %1828 = vmatprep.mubr.f32.mxu1 %v2604_v3 }
 0x1a5   : > { %1829 = vmatmul.mubr.f32.gmra.mrb[44].mxu1 %v2607_v4 }
 0x1a6   : > { %1831 = vmatprep.mubr.f32.mxu1 %v2612_v6 }
 0x1a8   : > { %v2711_v49 = vpop.f32.mrb[16].mxu0 }
 0x1a9   : > { %1832 = vmatmul.mubr.f32.gmra.mrb[46].mxu1 %v2615_v7  ;;  %v790_v50 = vpop.f32.mrb[17].mxu0 }
 0x1aa   : > { %1866 = vmatprep.mubr.f32.mxu1 %v790_v50 }
 0x1ac   : > { %v2713_v52 = vpop.f32.mrb[18].mxu0 }
 0x1ad   : > { %v2715_v53 = vpop.f32.mrb[19].mxu0 }
 0x1b0   : > { %v2717_v55 = vpop.f32.mrb[20].mxu0 }
 0x1b1   : > { %v2719_v56 = vpop.f32.mrb[21].mxu0 }
 0x1b4   : > { %v2721_v58 = vpop.f32.mrb[22].mxu0 }
 0x1b5   : > { %v2723_v59 = vpop.f32.mrb[23].mxu0 }
 0x1b8   : > { %v2725_v61 = vpop.f32.mrb[24].mxu0 }
 0x1b9   : > { %v2727_v62 = vpop.f32.mrb[25].mxu0 }
 0x1bc   : > { %v2729_v0 = vpop.f32.mrb[26].mxu0 }
 0x1bd   : > { %v2731_v1 = vpop.f32.mrb[27].mxu0 }
 0x1c0   : > { %v2733_v3 = vpop.f32.mrb[28].mxu0 }
 0x1c1   : > { %v2735_v4 = vpop.f32.mrb[29].mxu0 }
 0x1c4   : > { %v2737_v6 = vpop.f32.mrb[30].mxu0 }
 0x1c5   : > { %v2739_v7 = vpop.f32.mrb[31].mxu0 }
 0x240   : > { %v1700_v19 = vpop.f32.mrb[16].mxu1 }
 0x241   : > { %675 = vst [vmem:[%s2742_s20 + $0x8] sm:$0xff] %v1700_v19  ;;  %v595_v20 = vpop.f32.mrb[17].mxu1 }
 0x242   : > { %674 = vst [vmem:[%s2742_s20] sm:$0xff] %v595_v20 }
 0x244   : > { %v1703_v21 = vpop.f32.mrb[18].mxu1 }
 0x245   : > { %677 = vst [vmem:[%s2742_s20 + $0x18] sm:$0xff] %v1703_v21  ;;  %v605_v22 = vpop.f32.mrb[19].mxu1 }
 0x246   : > { %676 = vst [vmem:[%s2742_s20 + $0x10] sm:$0xff] %v605_v22 }
 0x248   : > { %v1706_v24 = vpop.f32.mrb[20].mxu1 }
 0x249   : > { %679 = vst [vmem:[%s2742_s20 + $0x28] sm:$0xff] %v1706_v24  ;;  %v615_v29 = vpop.f32.mrb[21].mxu1 }
 0x24a   : > { %678 = vst [vmem:[%s2742_s20 + $0x20] sm:$0xff] %v615_v29 }
 0x24c   : > { %v1709_v30 = vpop.f32.mrb[22].mxu1 }
 0x24d   : > { %681 = vst [vmem:[%s2742_s20 + $0x38] sm:$0xff] %v1709_v30  ;;  %v625_v31 = vpop.f32.mrb[23].mxu1 }
 0x24e   : > { %680 = vst [vmem:[%s2742_s20 + $0x30] sm:$0xff] %v625_v31 }
 0x250   : > { %v1712_v32 = vpop.f32.mrb[24].mxu1 }
 0x251   : > { %683 = vst [vmem:[%s2742_s20 + $0x48] sm:$0xff] %v1712_v32  ;;  %v635_v33 = vpop.f32.mrb[25].mxu1 }
 0x252   : > { %682 = vst [vmem:[%s2742_s20 + $0x40] sm:$0xff] %v635_v33 }
 0x254   : > { %v1715_v34 = vpop.f32.mrb[26].mxu1 }
 0x255   : > { %685 = vst [vmem:[%s2742_s20 + $0x58] sm:$0xff] %v1715_v34  ;;  %v645_v35 = vpop.f32.mrb[27].mxu1 }
 0x256   : > { %684 = vst [vmem:[%s2742_s20 + $0x50] sm:$0xff] %v645_v35 }
 0x258   : > { %v1718_v36 = vpop.f32.mrb[28].mxu1 }
 0x259   : > { %687 = vst [vmem:[%s2742_s20 + $0x68] sm:$0xff] %v1718_v36  ;;  %v655_v37 = vpop.f32.mrb[29].mxu1 }
 0x25a   : > { %686 = vst [vmem:[%s2742_s20 + $0x60] sm:$0xff] %v655_v37 }
 0x25c   : > { %v1721_v38 = vpop.f32.mrb[30].mxu1 }
 0x25d   : > { %689 = vst [vmem:[%s2742_s20 + $0x78] sm:$0xff] %v1721_v38  ;;  %v665_v39 = vpop.f32.mrb[31].mxu1 }
 0x25e   : > { %688 = vst [vmem:[%s2742_s20 + $0x70] sm:$0xff] %v665_v39 }
 0x260   : > { %v1812_v40 = vpop.f32.mrb[32].mxu1 }
 0x261   : > { %v935_v41 = vpop.f32.mrb[33].mxu1 }
 0x262   : > { %v2050_v42 = vpack.c.bf16 %v1812_v40, %v935_v41 }
 0x264   : > { %v1815_v43 = vpop.f32.mrb[34].mxu1  ;;  %2051 = vmatprep.subr.bf16.mxu1 %v2050_v42 }
 0x265   : > { %v945_v44 = vpop.f32.mrb[35].mxu1  ;;  %2053 = vmatpush3.bf16.msra.mxu1 %v2050_v42 }
 0x266   : > { %v2054_v45 = vpack.c.bf16 %v1815_v43, %v945_v44 }
 0x268   : > { %v1818_v46 = vpop.f32.mrb[36].mxu1  ;;  %2055 = vmatprep.subr.bf16.mxu1 %v2054_v45 }
 0x269   : > { %v955_v47 = vpop.f32.mrb[37].mxu1  ;;  %2057 = vmatpush3.bf16.msra.mxu1 %v2054_v45 }
 0x26a   : > { %v2058_v51 = vpack.c.bf16 %v1818_v46, %v955_v47 }
 0x26c   : > { %v1821_v54 = vpop.f32.mrb[38].mxu1  ;;  %2059 = vmatprep.subr.bf16.mxu1 %v2058_v51 }
 0x26d   : > { %v965_v57 = vpop.f32.mrb[39].mxu1  ;;  %2061 = vmatpush3.bf16.msra.mxu1 %v2058_v51 }
 0x26e   : > { %v2062_v60 = vpack.c.bf16 %v1821_v54, %v965_v57 }
 0x270   : > { %v1824_v63 = vpop.f32.mrb[40].mxu1  ;;  %2063 = vmatprep.subr.bf16.mxu1 %v2062_v60 }
 0x271   : > { %v975_v2 = vpop.f32.mrb[41].mxu1  ;;  %2065 = vmatpush3.bf16.msra.mxu1 %v2062_v60 }
 0x272   : > { %v2066_v5 = vpack.c.bf16 %v1824_v63, %v975_v2 }
 0x274   : > { %v1827_v8 = vpop.f32.mrb[42].mxu1  ;;  %2067 = vmatprep.subr.bf16.mxu1 %v2066_v5 }
 0x275   : > { %v985_v48 = vpop.f32.mrb[43].mxu1  ;;  %2069 = vmatpush3.bf16.msra.mxu1 %v2066_v5 }
 0x276   : > { %v2070_v9 = vpack.c.bf16 %v1827_v8, %v985_v48 }
 0x278   : > { %v1830_v23 = vpop.f32.mrb[44].mxu1  ;;  %2071 = vmatprep.subr.bf16.mxu1 %v2070_v9 }
 0x279   : > { %v995_v10 = vpop.f32.mrb[45].mxu1  ;;  %2073 = vmatpush3.bf16.msra.mxu1 %v2070_v9 }
 0x27a   : > { %v2074_v11 = vpack.c.bf16 %v1830_v23, %v995_v10 }
 0x27c   : > { %v1833_v25 = vpop.f32.mrb[46].mxu1  ;;  %2075 = vmatprep.subr.bf16.mxu1 %v2074_v11 }
 0x27d   : > { %v1005_v12 = vpop.f32.mrb[47].mxu1  ;;  %2077 = vmatpush3.bf16.msra.mxu1 %v2074_v11 }
 0x27e   : > { %v2078_v13 = vpack.c.bf16 %v1833_v25, %v1005_v12 }
 0x280   : > { %2079 = vmatprep.subr.bf16.mxu1 %v2078_v13 }
 0x281   : > { %2081 = vmatpush3.bf16.msra.mxu1 %v2078_v13 }
 0x284   : > { %1867 = vmatmul.mubr.f32.vlgmr.msra.gmra.mrb[48].mxu1 %v2711_v49 }
 0x285   : > { %1869 = vmatprep.mubr.f32.mxu1 %v2715_v53 }
 0x288   : > { %1870 = vmatmul.mubr.f32.gmra.mrb[50].mxu1 %v2713_v52 }
 0x289   : > { %1872 = vmatprep.mubr.f32.mxu1 %v2719_v56 }
 0x28c   : > { %1873 = vmatmul.mubr.f32.gmra.mrb[52].mxu1 %v2717_v55 }
 0x28d   : > { %1875 = vmatprep.mubr.f32.mxu1 %v2723_v59 }
 0x290   : > { %1876 = vmatmul.mubr.f32.gmra.mrb[54].mxu1 %v2721_v58 }
 0x291   : > { %1878 = vmatprep.mubr.f32.mxu1 %v2727_v62 }
 0x294   : > { %1879 = vmatmul.mubr.f32.gmra.mrb[56].mxu1 %v2725_v61 }
 0x295   : > { %1881 = vmatprep.mubr.f32.mxu1 %v2731_v1 }
 0x298   : > { %1882 = vmatmul.mubr.f32.gmra.mrb[58].mxu1 %v2729_v0 }
 0x299   : > { %1884 = vmatprep.mubr.f32.mxu1 %v2735_v4 }
 0x29c   : > { %1885 = vmatmul.mubr.f32.gmra.mrb[60].mxu1 %v2733_v3 }
 0x29d   : > { %1887 = vmatprep.mubr.f32.mxu1 %v2739_v7 }
 0x2a0   : > { %1888 = vmatmul.mubr.f32.gmra.mrb[62].mxu1 %v2737_v6 }
 0x357   : > { %v1868_v26 = vpop.f32.mrb[48].mxu1 }
 0x358   : > { %1335 = vst [vmem:[%s2742_s20 + $0x88] sm:$0xff] %v1868_v26  ;;  %v1080_v14 = vpop.f32.mrb[49].mxu1 }
 0x359   : > { %1334 = vst [vmem:[%s2742_s20 + $0x80] sm:$0xff] %v1080_v14 }
 0x35b   : > { %v1871_v15 = vpop.f32.mrb[50].mxu1 }
 0x35c   : > { %1337 = vst [vmem:[%s2742_s20 + $0x98] sm:$0xff] %v1871_v15  ;;  %v1090_v27 = vpop.f32.mrb[51].mxu1 }
 0x35d   : > { %1336 = vst [vmem:[%s2742_s20 + $0x90] sm:$0xff] %v1090_v27 }
 0x35f   : > { %v1874_v16 = vpop.f32.mrb[52].mxu1 }
 0x360   : > { %1339 = vst [vmem:[%s2742_s20 + $0xa8] sm:$0xff] %v1874_v16  ;;  %v1100_v17 = vpop.f32.mrb[53].mxu1 }
 0x361   : > { %1338 = vst [vmem:[%s2742_s20 + $0xa0] sm:$0xff] %v1100_v17 }
 0x363   : > { %v1877_v28 = vpop.f32.mrb[54].mxu1 }
 0x364   : > { %1341 = vst [vmem:[%s2742_s20 + $0xb8] sm:$0xff] %v1877_v28  ;;  %v1110_v18 = vpop.f32.mrb[55].mxu1 }
 0x365   : > { %1340 = vst [vmem:[%s2742_s20 + $0xb0] sm:$0xff] %v1110_v18 }
 0x367   : > { %v1880_v49 = vpop.f32.mrb[56].mxu1 }
 0x368   : > { %1343 = vst [vmem:[%s2742_s20 + $0xc8] sm:$0xff] %v1880_v49  ;;  %v1120_v50 = vpop.f32.mrb[57].mxu1 }
 0x369   : > { %1342 = vst [vmem:[%s2742_s20 + $0xc0] sm:$0xff] %v1120_v50 }
 0x36b   : > { %v1883_v52 = vpop.f32.mrb[58].mxu1 }
 0x36c   : > { %1345 = vst [vmem:[%s2742_s20 + $0xd8] sm:$0xff] %v1883_v52  ;;  %v1130_v53 = vpop.f32.mrb[59].mxu1 }
 0x36d   : > { %1344 = vst [vmem:[%s2742_s20 + $0xd0] sm:$0xff] %v1130_v53 }
 0x36f   : > { %v1886_v55 = vpop.f32.mrb[60].mxu1 }
 0x370   : > { %1347 = vst [vmem:[%s2742_s20 + $0xe8] sm:$0xff] %v1886_v55  ;;  %v1140_v56 = vpop.f32.mrb[61].mxu1 }
 0x371   : > { %1346 = vst [vmem:[%s2742_s20 + $0xe0] sm:$0xff] %v1140_v56 }
 0x373   : > { %v1889_v58 = vpop.f32.mrb[62].mxu1 }
 0x374   : > { %1349 = vst [vmem:[%s2742_s20 + $0xf8] sm:$0xff] %v1889_v58  ;;  %v1150_v59 = vpop.f32.mrb[63].mxu1 }
 0x375   : > { %1348 = vst [vmem:[%s2742_s20 + $0xf0] sm:$0xff] %v1150_v59 }
 0x376   : > { %2210 = shalt.err (!%p2207_p11)
}
 0x377   : > { %s2211_s7 = scalar_lea.hbm %s2794_s28, 4096  ;;  %s2215_s4 = scalar_lea.hbm %s2843_s2, 16384 }
 0x378   : > { %p2212_p7 = scmp.ne.s32.totalorder %s2794_s28, %s2211_s7  ;;  %p2216_p1 = scmp.lt.u32.totalorder %s2794_s28, %s2843_s2 }
 0x379   : > { %p2217_p3 = scmp.lt.u32.totalorder %s2215_s4, %s2211_s7  ;;  %p2219_p12 = scmp.lt.u32.totalorder %s2211_s7, %s2794_s28 }
 0x37a   : > { %p2213_p8 = pnand %p2212_p7, %p2853_p0 }
 0x37b   : > { %p2218_p6 = por %p2217_p3, %p2216_p1 }
 0x37c   : > { %p2214_p13 = pneg %p2213_p8 }
 0x37d   : > { %p2220_p2 = por %p2219_p12, %p2218_p6 }
 0x37f   : > { %p2221_p9 = pnand %p2220_p2, %p2214_p13 }
 0x381   : > { %2224 = shalt.err (!%p2221_p9)
}
 0x382   : > { %s2274_s23 = smov 128   ;;  %s2275_s29 = smov 8  }
 0x383   : > { %2086 = dma.vmem_to_hbm [thread:$0]  (%p2853_p0), %s2796_s6, 4096, %s2794_s28, %s1177_s24, %s2274_s23, %s2274_s23, %s2275_s29  }
 0x384 PF: > { %p2100_p4 = scmp.ge.s32.totalorder %s2267_s12, 2  ;;  %s1206_s20 = sand.u32 1, %s2255_s9  }
 0x385   : > { %p2854_p5 = scmp.ne.s32.totalorder %s2849_s22, 0  ;;  %s1207_s5 = scalar_lea.sflag [#allocation4], %s1206_s20 }
 0x387   : > { %p2096_p10 = pnand %p2100_p4, %p2854_p5 }
 0x389   : > { %2250 = dma.done.wait (!%p2096_p10), %s1207_s5, 4096  }
 0x38a   : > { %2252 = vsyncadd (!%p2096_p10), %s1207_s5, 4294963200  ;;  %p18_p11 = scmp.ge.s32.totalorder %s2316_s15, 6   ;;  %s2855_s9 = smov %s2259_s10 }
 0x38b   : > { %s2856_s10 = smov %s2263_s11  ;;  %s2857_s11 = smov %s2328_s18 }
 0x38c   : > { %s2858_s12 = smov %s2316_s15  ;;  %20 = sbr.rel (!%p18_p11) target bundleno = 7 (0x7), region = 89 }
 0x393   :  { %1212 = vsyncpa [#allocation3], 1 }
 0x394   :  { %1214 = vsyncpa [#allocation3 + $0x1], 1 }
 0x395   :  { %1215 = vsyncpa [#allocation6], 1 }
 0x396   :  { %1217 = vsyncpa [#allocation6 + $0x1], 1 }
 0x397   :  { %1218 = vsyncpa [#allocation4], 1 }
 0x398   :  { %1220 = vsyncpa [#allocation4 + $0x1], 1 }

</bundles_post_ra>
